<compile_context>
chip_gen: v5e
topology: v5e:2x2
jax: 0.10.0
libtpu: 0.0.40
codegen_flags: <defaults>
</compile_context>

<pallas_src>
import jax
import jax.numpy as jnp
from jax import lax
from jax.experimental import pallas as pl
from jax.experimental.pallas import tpu as pltpu


_ROLL_SIGN = None  # +1 if pltpu.roll follows jnp.roll semantics, -1 otherwise.


def _roll_sign():
    """Pin the pltpu.roll direction with a one-vreg probe (cached).

    The im2col taps need tap[p] = x[p + s]; with jnp.roll semantics that is a
    roll by -s.  A tiny eager probe locks the convention so a lowering-side sign
    difference can never silently mirror the convolution taps.
    """
    global _ROLL_SIGN
    if _ROLL_SIGN is None:
        def k(x_ref, o_ref):
            o_ref[...] = pltpu.roll(x_ref[...], shift=1, axis=1)

        x = lax.broadcasted_iota(jnp.float32, (8, 128), 1)
        y = pl.pallas_call(k, out_shape=jax.ShapeDtypeStruct((8, 128), jnp.float32))(x)
        # jnp.roll convention: element 0 becomes 127 after a +1 roll.
        _ROLL_SIGN = 1 if float(y[0, 0]) == 127.0 else -1
    return _ROLL_SIGN


def _default_images_per_step(n):
    """Fold the batch into each grid step (amortizes the ~0.35us/step overhead
    and the per-tap work) while keeping >= 2 'parallel' steps when possible so
    both v7x TensorCores get work.  Returns the largest divisor of n <= n // 2."""
    if n <= 1:
        return 1
    nb = n // 2
    while n % nb:
        nb -= 1
    return nb


def _celu(y):
    # CELU(alpha=1): y for y>0, exp(y)-1 for y<=0 (abs diff vs expm1 < 1e-7 here).
    return jnp.where(y > 0, y, jnp.exp(jnp.minimum(y, 0.0)) - 1.0)


def skip_block_forward(x, w1, b1, w2, b2, *, images_per_step=None):
    """SkipBlock.forward_op (spatial_dim=2, adjoint=False, conv2 stride=1).

    x : (N, Cin, H, W)
    w1: (Cin, Cin, 3, 3), b1: (Cin,)    conv1, padding='same'
    w2: (Cout, Cin, 3, 3), b2: (Cout,)  conv2, padding=0 (valid), stride=1
    returns (N, Cout, H-2, W-2)
    """
    N, C, H, W = x.shape
    Cout = w2.shape[0]
    assert w1.shape == (C, C, 3, 3) and w2.shape == (Cout, C, 3, 3)
    assert b1.shape == (C,) and b2.shape == (Cout,)
    Ho, Wo = H - 2, W - 2
    HW, HoWo = H * W, Ho * Wo
    assert HW % 128 == 0, "lane-dense layout assumes H*W is a multiple of 128"

    Nb = images_per_step if images_per_step is not None else _default_images_per_step(N)
    assert N % Nb == 0, "images_per_step must divide the batch size"
    G = N // Nb            # grid steps ("parallel" -> megacore split on v7x)
    L = Nb * HW            # folded lane extent per step (multiple of 128)

    Cpad = ((C + 7) // 8) * 8        # sublane-padded channels per im2col tap
    Copad = ((Cout + 7) // 8) * 8    # sublane-padded output channels of conv2
    K = 9 * Cpad                     # padded contraction dim (taps x channels)

    sign = _roll_sign()

    # ---- wrapper-side layout plumbing (lane-dense, sublane/channel padded) ----
    # x: (N,C,H,W) -> (G, Cpad, Nb*HW), image b of a step occupying lanes
    # [b*HW, (b+1)*HW); padded channel rows are exact zeros.
    x_p = jnp.pad(x.reshape(N, C, HW).astype(jnp.float32),
                  ((0, 0), (0, Cpad - C), (0, 0)))
    x_p = x_p.reshape(G, Nb, Cpad, HW).transpose(0, 2, 1, 3).reshape(G, Cpad, L)

    def _pack_w(w, out_pad):
        # (oc, C, 3, 3) -> (out_pad, 9*Cpad), tap-major columns matching the
        # im2col rows: col = (di*3+dj)*Cpad + ci; padded rows/cols are zero.
        oc = w.shape[0]
        wt = jnp.transpose(w, (0, 2, 3, 1)).astype(jnp.float32)      # (oc,3,3,C)
        wt = jnp.pad(wt, ((0, out_pad - oc), (0, 0), (0, 0), (0, Cpad - C)))
        return wt.reshape(out_pad, K)

    w1m = _pack_w(w1, Cpad)
    w2m = _pack_w(w2, Copad)
    b1c = jnp.pad(b1.astype(jnp.float32), (0, Cpad - C)).reshape(Cpad, 1)
    b2c = jnp.pad(b2.astype(jnp.float32), (0, Copad - Cout)).reshape(Copad, 1)

    def kernel(x_ref, w1_ref, b1_ref, w2_ref, b2_ref, o_ref, col_ref):
        x_in = x_ref[0].astype(jnp.float32)                      # (Cpad, L)

        # Per-lane (row, col) position inside each image + boundary masks.
        # Hoisted once per grid step, shared by both convs and all taps.
        q = lax.broadcasted_iota(jnp.int32, (1, L), 1) % HW
        r, c = q // W, q % W
        ones = jnp.ones((1, L), jnp.float32)
        row_m = ((r != 0).astype(jnp.float32), ones, (r != H - 1).astype(jnp.float32))
        col_m = ((c != 0).astype(jnp.float32), ones, (c != W - 1).astype(jnp.float32))
        interior = row_m[0] * row_m[2] * col_m[0] * col_m[2]     # conv2 'valid' region

        def conv3x3_same(inp, w_ref, b_ref):
            # im2col: tap (di, dj) is a circular lane roll of the flat image(s);
            # every lane whose source crosses an image edge (incl. the roll wrap
            # across folded images) lies in a masked row/col, so the masks make
            # the roll exact zero padding.  Each tap is one full (Cpad, L)
            # sublane/lane-aligned store; then a single MXU matmul.
            for k in range(9):
                di, dj = divmod(k, 3)
                s = (di - 1) * W + (dj - 1)            # flat source offset of tap
                tap = inp if s == 0 else pltpu.roll(inp, shift=(-sign * s) % L, axis=1)
                if di != 1:
                    tap = tap * row_m[di]
                if dj != 1:
                    tap = tap * col_m[dj]
                col_ref[k * Cpad:(k + 1) * Cpad, :] = tap
            return jnp.dot(w_ref[...], col_ref[...],
                           preferred_element_type=jnp.float32) + b_ref[...]

        def norm_celu(y, mask, count):
            # nn.InstanceNorm2d defaults (affine=False, eps=1e-5, biased var),
            # two-pass variance, statistics per image over the `count` positions
            # selected by `mask` (None -> all HW positions), then CELU(alpha=1).
            inv_n = 1.0 / float(count)
            pieces = []
            for b in range(Nb):   # lane-aligned per-image slices (HW % 128 == 0)
                yb = y[:, b * HW:(b + 1) * HW]
                msel = None if mask is None else mask[:, b * HW:(b + 1) * HW]
                ym = yb if msel is None else yb * msel
                mean = jnp.sum(ym, axis=-1, keepdims=True) * inv_n
                d = yb - mean
                dm = d if msel is None else d * msel
                var = jnp.sum(dm * dm, axis=-1, keepdims=True) * inv_n
                yn = d * lax.rsqrt(var + 1e-5)
                pieces.append(_celu(yn))
            return pieces[0] if Nb == 1 else jnp.concatenate(pieces, axis=-1)

        # conv1 ('same', C -> C) -> instance norm -> CELU -> skip add.
        y1 = conv3x3_same(x_in, w1_ref, b1_ref)                  # (Cpad, L)
        x1 = norm_celu(y1, None, HW) + x_in                      # pad rows stay 0

        # conv2 ('valid' == centre crop of 'same', stride 1, C -> Cout): compute
        # the full 'same' map, normalize with interior-only statistics, write the
        # full-width lane-dense map (unmasked stores); the wrapper does the crop.
        y2 = conv3x3_same(x1, w2_ref, b2_ref)                    # (Copad, L)
        out = norm_celu(y2, interior, HoWo)                      # (Copad, L)
        o_ref[...] = out[None].astype(o_ref.dtype)

    out_full = pl.pallas_call(
        kernel,
        out_shape=jax.ShapeDtypeStruct((G, Copad, L), x.dtype),
        grid_spec=pltpu.PrefetchScalarGridSpec(
            num_scalar_prefetch=0,
            grid=(G,),
            in_specs=[
                pl.BlockSpec((1, Cpad, L), lambda n: (n, 0, 0)),
                pl.BlockSpec((Cpad, K), lambda n: (0, 0)),
                pl.BlockSpec((Cpad, 1), lambda n: (0, 0)),
                pl.BlockSpec((Copad, K), lambda n: (0, 0)),
                pl.BlockSpec((Copad, 1), lambda n: (0, 0)),
            ],
            out_specs=pl.BlockSpec((1, Copad, L), lambda n: (n, 0, 0)),
            scratch_shapes=[
                pltpu.VMEM((K, L), jnp.float32),   # im2col (shared by both convs)
            ],
        ),
        compiler_params=pltpu.CompilerParams(dimension_semantics=("parallel",)),
    )(x_p, w1m, b1c, w2m, b2c)

    # Un-fold the batch, drop channel padding, crop to the 'valid' conv2 output.
    out_full = out_full.reshape(G, Copad, Nb, HW).transpose(0, 2, 1, 3)
    out_full = out_full.reshape(N, Copad, H, W)
    return out_full[:, :Cout, 1:H - 1, 1:W - 1].astype(x.dtype)


def reference_forward(x, w1, b1, w2, b2):
    """Pure-JAX reference (XLA convs) for validation."""
    dn = lax.conv_dimension_numbers(x.shape, w1.shape, ("NCHW", "OIHW", "NCHW"))

    def inorm(y):
        m = jnp.mean(y, axis=(2, 3), keepdims=True)
        v = jnp.mean((y - m) ** 2, axis=(2, 3), keepdims=True)
        return (y - m) / jnp.sqrt(v + 1e-5)

    def celu(y):
        return jnp.where(y > 0, y, jnp.expm1(jnp.minimum(y, 0.0)))

    y1 = lax.conv_general_dilated(x, w1, (1, 1), "SAME",
                                  dimension_numbers=dn) + b1[None, :, None, None]
    x1 = celu(inorm(y1)) + x
    y2 = lax.conv_general_dilated(x1, w2, (1, 1), "VALID",
                                  dimension_numbers=dn) + b2[None, :, None, None]
    return celu(inorm(y2))


if __name__ == "__main__":
    # SkipBlock(spatial_dim=2, in_points=16, out_points=8, in_channels=4,
    #           out_channels=8, kernel_size=3, adjoint=False):
    #   conv1 = Conv2d(4, 4, 3, padding='same')
    #   conv2 = Conv2d(4, 8, 3, stride=floor((16-3)/(8-1)) = 1)   (valid padding)
    N, C_in, C_out, H, W = 2, 4, 8, 16, 16
    in_points, out_points, ksize = 16, 8, 3
    stride = (in_points - ksize) // (out_points - 1)
    assert stride == 1, "only the stride-1 conv2 configuration is implemented"

    key = jax.random.PRNGKey(0)
    kx, kw1, kb1, kw2, kb2 = jax.random.split(key, 5)
    x = jax.random.normal(kx, (N, C_in, H, W), dtype=jnp.float32)
    w1 = 0.1 * jax.random.normal(kw1, (C_in, C_in, 3, 3), dtype=jnp.float32)
    b1 = 0.1 * jax.random.normal(kb1, (C_in,), dtype=jnp.float32)
    w2 = 0.1 * jax.random.normal(kw2, (C_out, C_in, 3, 3), dtype=jnp.float32)
    b2 = 0.1 * jax.random.normal(kb2, (C_out,), dtype=jnp.float32)

    out = jax.block_until_ready(skip_block_forward(x, w1, b1, w2, b2))
    ref = jax.block_until_ready(reference_forward(x, w1, b1, w2, b2))

    assert out.shape == (N, C_out, H - 2, W - 2), out.shape
    max_err = float(jnp.max(jnp.abs(out - ref)))
    assert jnp.allclose(out, ref, rtol=1e-3, atol=1e-3), max_err
    print("KERNEL_OK")
</pallas_src>

<mosaic_0001>
module attributes {stable_mosaic.version = 11 : i64} {
  func.func @k(%arg0: memref<8x128xf32, #tpu.memory_space<vmem>>, %arg1: memref<8x128xf32, #tpu.memory_space<vmem>>) attributes {dimension_semantics = [], scalar_prefetch = 0 : i64, scratch_operands = 0 : i64, tpu.core_type = #tpu.core_type<tc>} {
    %c0 = arith.constant 0 : index
    %c0_0 = arith.constant 0 : index
    %0 = vector.load %arg0[%c0, %c0_0] : memref<8x128xf32, #tpu.memory_space<vmem>>, vector<8x128xf32>
    %c1_i32 = arith.constant 1 : i32
    %1 = tpu.dynamic_rotate %0 by %c1_i32 dim 1 : vector<8x128xf32>, i32 -> vector<8x128xf32>
    %c0_1 = arith.constant 0 : index
    %c0_2 = arith.constant 0 : index
    %2 = vector.load %arg1[%c0_1, %c0_2] : memref<8x128xf32, #tpu.memory_space<vmem>>, vector<8x128xf32>
    tpu.vector_store %arg1[%c0_1, %c0_2], %1 {strides = array<i32>} : memref<8x128xf32, #tpu.memory_space<vmem>>, vector<8x128xf32>,
    return
  }
}

</mosaic_0001>

<bundles_post_ra>
// kernel: tpu_custom_call.1
= control target key start
LH: loop header
LB: loop body
LE: loop exit
PB: predicated region body
PF: predicated region fallthrough
CT: control target
= control target key end

     0   :  { %6 = vsyncpa [#allocation3], 0  ;;  %s118_s0 = inlined_call_operand.hbm [shape: f32[8,128], index: 0, kind: input, shape index: {}]   ;;  %s119_s1 = inlined_call_operand.hbm [shape: f32[8,128], index: 1, kind: output, shape index: {}]  }
   0x1   :  { %7 = vsyncpa [#allocation4], 0  ;;  %s13_s8 = sshll.u32 %s118_s0, 4  ;;  %s99_s9 = smov [#allocation2]   ;;  %s14_s8 = int_to_ptr.hbm [resolvable:$true] %s13_s8 }
   0x2   :  { %s15_s10 = sshll.u32 %s99_s9, 4  ;;  %s16_s10 = int_to_ptr.vmem [resolvable:$true] %s15_s10 }
   0x3   :  { %18 = dma.hbm_to_vmem [thread:$0]  %s14_s8, 128, %s16_s10, [#allocation3]  }
   0x4   :  { %95 = dma.done.wait [#allocation3], 128  }
   0x5   :  { %96 = vsyncadd [#allocation3], 4294967168  ;;  %v23_v0 = vld [vmem:[#allocation2] sm:$0xff]  ;;  %s100_s11 = smov 1   ;;  %s101_s12 = smov [#allocation5]  }
   0x6   :  { %24 = vrot.lane.b32.xlu0 %v23_v0, %s100_s11  ;;  %s32_s13 = sshll.u32 %s101_s12, 4  ;;  %s34_s16 = sshll.u32 %s119_s1, 4  ;;  %s33_s13 = int_to_ptr.vmem [resolvable:$true] %s32_s13  ;;  %s35_s16 = int_to_ptr.hbm [resolvable:$true] %s34_s16 }
  0x78   :  { %v25_v1 = vpop.permute.xlu0 %24 }
  0x79   :  { %26 = vst [vmem:[#allocation5] sm:$0xff] %v25_v1 }
  0x7a   :  { %37 = dma.vmem_to_hbm [thread:$0]  %s33_s13, 128, %s35_s16, [#allocation4]  }
  0x7b   :  { %97 = dma.done.wait [#allocation4], 128  }
  0x7c   :  { %98 = vsyncadd [#allocation4], 4294967168 }
  0x7d   :  { %42 = vsyncpa [#allocation3], 1 }
  0x7e   :  { %43 = vsyncpa [#allocation4], 1 }

</bundles_post_ra>
